<compile_context>
chip_gen: v6e
topology: v6e:2x2x1
jax: 0.10.0
libtpu: 0.0.40
codegen_flags: <defaults>
</compile_context>

<pallas_src>
import jax
import jax.numpy as jnp
from jax.experimental import pallas as pl
from jax.experimental.pallas import tpu as pltpu


def ch_8x(ch):
    return int((ch + 7) // 8 * 8)


def _make_se_kernel(bt, channels):
    """Kernel over one (bt*channels, HW) block holding bt whole batch elements."""

    def kernel(x_ref, w1_ref, b1_ref, w2_ref, b2_ref, o_ref):
        hw = x_ref.shape[-1]
        inv_hw = 1.0 / hw
        # Tiny f32 parameters, loaded once per grid step (hoisted out of loop).
        w1 = w1_ref[...]          # (S, C)  -- PyTorch Linear layout (out, in)
        b1 = b1_ref[...]          # (S, 1)
        w2 = w2_ref[...]          # (C, S)
        b2 = b2_ref[...]          # (C, 1)

        for b in range(bt):       # short, statically unrolled per-batch loop
            r0 = b * channels
            # 1) global average pool over HW (lane reduction, f32 accumulate,
            #    no full f32 copy of the streamed tile is materialized).
            chunk = x_ref[r0:r0 + channels, :]
            x_avg = jnp.sum(chunk, axis=-1, dtype=jnp.float32,
                            keepdims=True) * inv_hw                   # (C, 1)
            # 2) Linear(C -> S) + ReLU in column orientation (matvec).
            h = jnp.dot(w1, x_avg, preferred_element_type=jnp.float32) + b1
            h = jnp.maximum(h, 0.0)                                   # (S, 1)
            # 3) Linear(S -> C) + h_sigmoid  (relu6(y + 3) / 6).
            s = jnp.dot(w2, h, preferred_element_type=jnp.float32) + b2
            s = jnp.clip(s + 3.0, 0.0, 6.0) * (1.0 / 6.0)             # (C, 1)
            # 4) channel-wise rescale.  Re-read the chunk so the streamed tile
            #    is not kept live across the FC section; multiply in f32 and
            #    cast exactly once at the store.
            o_ref[r0:r0 + channels, :] = (
                x_ref[r0:r0 + channels, :].astype(jnp.float32) * s
            ).astype(o_ref.dtype)

    return kernel


def _tpu_capacity():
    """(vmem_capacity_bytes, multi_tensorcore) with a conservative fallback."""
    try:
        info = pltpu.get_tpu_info()
        vmem = int(info.vmem_capacity_bytes)
        if vmem <= 0:
            raise ValueError("bad vmem capacity")
    except Exception:
        vmem = 64 << 20            # conservative: assume the smaller (v7x) VMEM
    # v7x-class chips: 64 MiB VMEM per TensorCore, 2 TCs sharing the grid;
    # v5e/v6e: 128 MiB, single TC.  Use VMEM capacity as the generation proxy.
    multi_tc = vmem <= (96 << 20)
    return vmem, multi_tc


def _choose_block_batch(batch, channels, per_b_bytes, *, target_tile_bytes,
                        prefer_multi_step, max_unroll=32):
    """How many whole batch elements go into one (bt*C, HW) block.

    Legal bt: divides B, and bt*C rows keep the block's sublane dim either a
    multiple of 8 or the full flattened extent (bt == B).  Among legal sizes
    that fit the per-tile byte budget take the largest; on multi-TC chips
    prefer sizes that still leave >= 2 grid steps so both cores get work.
    """
    cands = sorted({d for d in range(1, batch + 1)
                    if batch % d == 0 and ((d * channels) % 8 == 0 or d == batch)})
    bounded = [d for d in cands if d <= max_unroll] or [min(cands)]
    fitting = [d for d in bounded if d * per_b_bytes <= target_tile_bytes]
    if not fitting:
        fitting = [min(bounded)]   # smallest legal tile; VMEM guard checks it
    if prefer_multi_step:
        multi = [d for d in fitting if batch // d >= 2]
        if multi:
            return max(multi)
    return max(fitting)


def se_module(x_nchw, w1, b1, w2, b2, *, block_batch=None, donate_input=False):
    """SE block forward.

    x_nchw: (B, C, H, W).  w1: (S, C), b1: (S,), w2: (C, S), b2: (C,)
    (PyTorch nn.Linear convention: weight is (out_features, in_features)).
    Output dtype matches the input dtype (bf16 stays bf16 on the stream path).
    """
    B, C, H, W = x_nchw.shape
    S = w1.shape[0]
    HW = H * W

    x2d = x_nchw.reshape(B * C, HW)                  # lane-dense streamed slab
    w1_f = jnp.asarray(w1, jnp.float32)              # (S, C)
    w2_f = jnp.asarray(w2, jnp.float32)              # (C, S)
    b1_c = jnp.asarray(b1, jnp.float32).reshape(S, 1)
    b2_c = jnp.asarray(b2, jnp.float32).reshape(C, 1)

    itemsize = jnp.dtype(x2d.dtype).itemsize
    per_b_bytes = C * HW * itemsize

    vmem_cap, multi_tc = _tpu_capacity()
    target_tile_bytes = (4 << 20) if multi_tc else (8 << 20)

    if block_batch is not None:
        bt = int(block_batch)
        if B % bt != 0 or ((bt * C) % 8 != 0 and bt != B):
            raise ValueError(
                "block_batch must divide the batch and keep block_batch*C a "
                "multiple of 8 (or cover the whole batch)")
    else:
        bt = _choose_block_batch(B, C, per_b_bytes,
                                 target_tile_bytes=target_tile_bytes,
                                 prefer_multi_step=multi_tc)

    rows = bt * C
    tile_bytes = rows * HW * itemsize
    weight_bytes = 4 * (S * C + S + C * S + C)
    # 2 double-buffered tile buffers (x in + out) + double-buffered params.
    need = 4 * tile_bytes + 2 * weight_bytes
    headroom = 6 << 20                               # compiler-internal scratch
    budget = int(0.75 * vmem_cap)
    if need + headroom > budget:
        raise ValueError(
            f"SE tile of {tile_bytes} bytes (block_batch={bt}, C={C}, HW={HW}) "
            f"needs ~{need + headroom} bytes of VMEM but only {budget} bytes "
            f"are budgeted on this chip; use a smaller block_batch or add an "
            f"HW-chunked two-phase variant for this feature-map size.")
    vmem_limit = min(max(need + headroom, 16 << 20), budget)

    grid = (B // bt,)
    out = pl.pallas_call(
        _make_se_kernel(bt, C),
        out_shape=jax.ShapeDtypeStruct((B * C, HW), x2d.dtype),
        grid_spec=pltpu.PrefetchScalarGridSpec(
            num_scalar_prefetch=0,
            grid=grid,
            in_specs=[
                pl.BlockSpec((rows, HW), lambda i: (i, 0)),   # streamed x slab
                pl.BlockSpec((S, C), lambda i: (0, 0)),       # fc1 weight
                pl.BlockSpec((S, 1), lambda i: (0, 0)),       # fc1 bias (col)
                pl.BlockSpec((C, S), lambda i: (0, 0)),       # fc2 weight
                pl.BlockSpec((C, 1), lambda i: (0, 0)),       # fc2 bias (col)
            ],
            out_specs=pl.BlockSpec((rows, HW), lambda i: (i, 0)),
        ),
        compiler_params=pltpu.CompilerParams(
            dimension_semantics=("parallel",),
            vmem_limit_bytes=vmem_limit,
        ),
        input_output_aliases={0: 0} if donate_input else {},
    )(x2d, w1_f, b1_c, w2_f, b2_c)

    return out.reshape(B, C, H, W)


def se_reference(x_nchw, w1, b1, w2, b2):
    """Plain-JAX reference mirroring the PyTorch forward."""
    x_avg = jnp.mean(x_nchw.astype(jnp.float32), axis=(2, 3))     # (B, C)
    h = jnp.maximum(x_avg @ w1.T + b1, 0.0)                       # (B, S)
    s = jnp.clip((h @ w2.T + b2) + 3.0, 0.0, 6.0) / 6.0           # (B, C)
    return (x_nchw.astype(jnp.float32) * s[:, :, None, None]).astype(x_nchw.dtype)


if __name__ == "__main__":
    # Small shapes consistent with the module: batch=2, channels=4, spatial=16
    B, C, H, W = 2, 4, 16, 16
    reduction = 4
    S = ch_8x(C / reduction)   # = 8

    key = jax.random.PRNGKey(0)
    kx, k1, k2, k3, k4 = jax.random.split(key, 5)

    x = jax.random.normal(kx, (B, C, H, W), dtype=jnp.float32)
    # PyTorch Linear parameter shapes: weight (out, in), bias (out,)
    w1 = jax.random.normal(k1, (S, C), dtype=jnp.float32) * 0.1
    b1 = jax.random.normal(k2, (S,), dtype=jnp.float32) * 0.1
    w2 = jax.random.normal(k3, (C, S), dtype=jnp.float32) * 0.1
    b2 = jax.random.normal(k4, (C,), dtype=jnp.float32) * 0.1

    out = jax.block_until_ready(se_module(x, w1, b1, w2, b2))
    ref = jax.block_until_ready(se_reference(x, w1, b1, w2, b2))

    assert out.shape == (B, C, H, W)
    assert out.dtype == x.dtype
    assert jnp.allclose(out, ref, atol=1e-5, rtol=1e-5)

    print("KERNEL_OK")
</pallas_src>

<mosaic_0001>
module attributes {stable_mosaic.version = 11 : i64} {
  func.func @kernel(%arg0: i32, %arg1: memref<8x256xf32, #tpu.memory_space<vmem>>, %arg2: memref<8x4xf32, #tpu.memory_space<vmem>>, %arg3: memref<8x1xf32, #tpu.memory_space<vmem>>, %arg4: memref<4x8xf32, #tpu.memory_space<vmem>>, %arg5: memref<4x1xf32, #tpu.memory_space<vmem>>, %arg6: memref<8x256xf32, #tpu.memory_space<vmem>>) attributes {dimension_semantics = [#tpu.dimension_semantics<parallel>], iteration_bounds = array<i64: 1>, scalar_prefetch = 0 : i64, scratch_operands = 0 : i64, tpu.core_type = #tpu.core_type<tc>, window_params = [{transform_indices = @transform_0, window_bounds = array<i64: 8, 256>}, {pipeline_mode = #tpu.pipeline_mode<synchronous>, transform_indices = @transform_1, window_bounds = array<i64: 8, 4>}, {pipeline_mode = #tpu.pipeline_mode<synchronous>, transform_indices = @transform_2, window_bounds = array<i64: 8, 1>}, {pipeline_mode = #tpu.pipeline_mode<synchronous>, transform_indices = @transform_3, window_bounds = array<i64: 4, 8>}, {pipeline_mode = #tpu.pipeline_mode<synchronous>, transform_indices = @transform_4, window_bounds = array<i64: 4, 1>}, {transform_indices = @transform_5, window_bounds = array<i64: 8, 256>}]} {
    %c0 = arith.constant 0 : index
    %c0_0 = arith.constant 0 : index
    %0 = vector.load %arg2[%c0, %c0_0] : memref<8x4xf32, #tpu.memory_space<vmem>>, vector<8x4xf32>
    %c0_1 = arith.constant 0 : index
    %c0_2 = arith.constant 0 : index
    %1 = vector.load %arg3[%c0_1, %c0_2] : memref<8x1xf32, #tpu.memory_space<vmem>>, vector<8x1xf32>
    %c0_3 = arith.constant 0 : index
    %c0_4 = arith.constant 0 : index
    %2 = vector.load %arg4[%c0_3, %c0_4] : memref<4x8xf32, #tpu.memory_space<vmem>>, vector<4x8xf32>
    %c0_5 = arith.constant 0 : index
    %c0_6 = arith.constant 0 : index
    %3 = vector.load %arg5[%c0_5, %c0_6] : memref<4x1xf32, #tpu.memory_space<vmem>>, vector<4x1xf32>
    %c0_7 = arith.constant 0 : index
    %c0_8 = arith.constant 0 : index
    %4 = vector.load %arg1[%c0_7, %c0_8] : memref<8x256xf32, #tpu.memory_space<vmem>>, vector<4x256xf32>
    %cst = arith.constant dense<0.000000e+00> : vector<4xf32>
    %5 = vector.multi_reduction <add>, %4, %cst [1] : vector<4x256xf32> to vector<4xf32>
    %6 = vector.shape_cast %5 : vector<4xf32> to vector<4x1xf32>
    %cst_9 = arith.constant 3.906250e-03 : f32
    %7 = vector.broadcast %cst_9 : f32 to vector<4x1xf32>
    %8 = arith.mulf %6, %7 : vector<4x1xf32>
    %cst_10 = arith.constant dense<0.000000e+00> : vector<8x1xf32>
    %9 = tpu.matmul %0, %8, %cst_10 {dimension_numbers = #tpu.dot_dimension_numbers<[1], [0], [0], [1], [0, 0, 1, 1], [], []>} : vector<8x4xf32>, vector<4x1xf32>, vector<8x1xf32> -> vector<8x1xf32>
    %10 = arith.addf %9, %1 : vector<8x1xf32>
    %cst_11 = arith.constant 0.000000e+00 : f32
    %11 = vector.broadcast %cst_11 : f32 to vector<8x1xf32>
    %12 = arith.maximumf %10, %11 : vector<8x1xf32>
    %cst_12 = arith.constant dense<0.000000e+00> : vector<4x1xf32>
    %13 = tpu.matmul %2, %12, %cst_12 {dimension_numbers = #tpu.dot_dimension_numbers<[1], [0], [0], [1], [0, 0, 1, 1], [], []>} : vector<4x8xf32>, vector<8x1xf32>, vector<4x1xf32> -> vector<4x1xf32>
    %14 = arith.addf %13, %3 : vector<4x1xf32>
    %cst_13 = arith.constant 3.000000e+00 : f32
    %15 = vector.broadcast %cst_13 : f32 to vector<4x1xf32>
    %16 = arith.addf %14, %15 : vector<4x1xf32>
    %cst_14 = arith.constant 0.000000e+00 : f32
    %cst_15 = arith.constant 6.000000e+00 : f32
    %17 = vector.broadcast %cst_14 : f32 to vector<4x1xf32>
    %18 = arith.maximumf %17, %16 : vector<4x1xf32>
    %19 = vector.broadcast %cst_15 : f32 to vector<4x1xf32>
    %20 = arith.minimumf %19, %18 : vector<4x1xf32>
    %cst_16 = arith.constant 0.166666672 : f32
    %21 = vector.broadcast %cst_16 : f32 to vector<4x1xf32>
    %22 = arith.mulf %20, %21 : vector<4x1xf32>
    %c0_17 = arith.constant 0 : index
    %c0_18 = arith.constant 0 : index
    %23 = vector.load %arg1[%c0_17, %c0_18] : memref<8x256xf32, #tpu.memory_space<vmem>>, vector<4x256xf32>
    %24 = vector.broadcast %22 : vector<4x1xf32> to vector<4x256xf32>
    %25 = arith.mulf %23, %24 : vector<4x256xf32>
    %c0_19 = arith.constant 0 : index
    %c0_20 = arith.constant 0 : index
    %26 = vector.load %arg6[%c0_19, %c0_20] : memref<8x256xf32, #tpu.memory_space<vmem>>, vector<4x256xf32>
    tpu.vector_store %arg6[%c0_19, %c0_20], %25 {strides = array<i32>} : memref<8x256xf32, #tpu.memory_space<vmem>>, vector<4x256xf32>,
    %c4 = arith.constant 4 : index
    %c0_21 = arith.constant 0 : index
    %27 = vector.load %arg1[%c4, %c0_21] : memref<8x256xf32, #tpu.memory_space<vmem>>, vector<4x256xf32>
    %cst_22 = arith.constant dense<0.000000e+00> : vector<4xf32>
    %28 = vector.multi_reduction <add>, %27, %cst_22 [1] : vector<4x256xf32> to vector<4xf32>
    %29 = vector.shape_cast %28 : vector<4xf32> to vector<4x1xf32>
    %cst_23 = arith.constant 3.906250e-03 : f32
    %30 = vector.broadcast %cst_23 : f32 to vector<4x1xf32>
    %31 = arith.mulf %29, %30 : vector<4x1xf32>
    %cst_24 = arith.constant dense<0.000000e+00> : vector<8x1xf32>
    %32 = tpu.matmul %0, %31, %cst_24 {dimension_numbers = #tpu.dot_dimension_numbers<[1], [0], [0], [1], [0, 0, 1, 1], [], []>} : vector<8x4xf32>, vector<4x1xf32>, vector<8x1xf32> -> vector<8x1xf32>
    %33 = arith.addf %32, %1 : vector<8x1xf32>
    %cst_25 = arith.constant 0.000000e+00 : f32
    %34 = vector.broadcast %cst_25 : f32 to vector<8x1xf32>
    %35 = arith.maximumf %33, %34 : vector<8x1xf32>
    %cst_26 = arith.constant dense<0.000000e+00> : vector<4x1xf32>
    %36 = tpu.matmul %2, %35, %cst_26 {dimension_numbers = #tpu.dot_dimension_numbers<[1], [0], [0], [1], [0, 0, 1, 1], [], []>} : vector<4x8xf32>, vector<8x1xf32>, vector<4x1xf32> -> vector<4x1xf32>
    %37 = arith.addf %36, %3 : vector<4x1xf32>
    %cst_27 = arith.constant 3.000000e+00 : f32
    %38 = vector.broadcast %cst_27 : f32 to vector<4x1xf32>
    %39 = arith.addf %37, %38 : vector<4x1xf32>
    %cst_28 = arith.constant 0.000000e+00 : f32
    %cst_29 = arith.constant 6.000000e+00 : f32
    %40 = vector.broadcast %cst_28 : f32 to vector<4x1xf32>
    %41 = arith.maximumf %40, %39 : vector<4x1xf32>
    %42 = vector.broadcast %cst_29 : f32 to vector<4x1xf32>
    %43 = arith.minimumf %42, %41 : vector<4x1xf32>
    %cst_30 = arith.constant 0.166666672 : f32
    %44 = vector.broadcast %cst_30 : f32 to vector<4x1xf32>
    %45 = arith.mulf %43, %44 : vector<4x1xf32>
    %c4_31 = arith.constant 4 : index
    %c0_32 = arith.constant 0 : index
    %46 = vector.load %arg1[%c4_31, %c0_32] : memref<8x256xf32, #tpu.memory_space<vmem>>, vector<4x256xf32>
    %47 = vector.broadcast %45 : vector<4x1xf32> to vector<4x256xf32>
    %48 = arith.mulf %46, %47 : vector<4x256xf32>
    %c4_33 = arith.constant 4 : index
    %c0_34 = arith.constant 0 : index
    %49 = vector.load %arg6[%c4_33, %c0_34] : memref<8x256xf32, #tpu.memory_space<vmem>>, vector<4x256xf32>
    tpu.vector_store %arg6[%c4_33, %c0_34], %48 {strides = array<i32>} : memref<8x256xf32, #tpu.memory_space<vmem>>, vector<4x256xf32>,
    return
  }
  func.func @transform_0(%arg0: i32) -> (i32, i32) {
    %c0_i32 = arith.constant 0 : i32
    %c0_i32_0 = arith.constant 0 : i32
    return %arg0, %c0_i32 : i32, i32
  }
  func.func @transform_1(%arg0: i32) -> (i32, i32) {
    %c0_i32 = arith.constant 0 : i32
    %c0_i32_0 = arith.constant 0 : i32
    %c0_i32_1 = arith.constant 0 : i32
    return %c0_i32, %c0_i32_0 : i32, i32
  }
  func.func @transform_2(%arg0: i32) -> (i32, i32) {
    %c0_i32 = arith.constant 0 : i32
    %c0_i32_0 = arith.constant 0 : i32
    %c0_i32_1 = arith.constant 0 : i32
    return %c0_i32, %c0_i32_0 : i32, i32
  }
  func.func @transform_3(%arg0: i32) -> (i32, i32) {
    %c0_i32 = arith.constant 0 : i32
    %c0_i32_0 = arith.constant 0 : i32
    %c0_i32_1 = arith.constant 0 : i32
    return %c0_i32, %c0_i32_0 : i32, i32
  }
  func.func @transform_4(%arg0: i32) -> (i32, i32) {
    %c0_i32 = arith.constant 0 : i32
    %c0_i32_0 = arith.constant 0 : i32
    %c0_i32_1 = arith.constant 0 : i32
    return %c0_i32, %c0_i32_0 : i32, i32
  }
  func.func @transform_5(%arg0: i32) -> (i32, i32) {
    %c0_i32 = arith.constant 0 : i32
    %c0_i32_0 = arith.constant 0 : i32
    return %arg0, %c0_i32 : i32, i32
  }
}

</mosaic_0001>

<bundles_post_ra>
// kernel: tpu_custom_call.1
= control target key start
LH: loop header
LB: loop body
LE: loop exit
PB: predicated region body
PF: predicated region fallthrough
CT: control target
= control target key end

     0   :  { %vm27_vm0 = vcmask 1043456   ;;  %vm201_vm1 = vcmask 1047556   ;;  %s528_s0 = inlined_call_operand.vmem [shape: f32[8,256], index: 0, kind: input, shape index: {}]   ;;  %s529_s1 = inlined_call_operand.vmem [shape: f32[8,4], index: 1, kind: input, shape index: {}]   ;;  %s530_s2 = inlined_call_operand.vmem [shape: f32[8,1], index: 2, kind: input, shape index: {}]   ;;  %s531_s3 = inlined_call_operand.vmem [shape: f32[4,8], index: 3, kind: input, shape index: {}]   ;;  %s532_s4 = inlined_call_operand.vmem [shape: f32[4,1], index: 4, kind: input, shape index: {}]   ;;  %s533_s5 = inlined_call_operand.hbm [shape: f32[8,256], index: 5, kind: output, shape index: {}]  }
   0x1   :  { %v480_v0 = vld [vmem:[%s528_s0] sm:$0xf]  ;;  %v485_v1 = vld [vmem:[%s528_s0 + $0x8] sm:$0xf]  ;;  %v494_v4 = vld [vmem:[%s528_s0] sm:$0xf0] }
   0x2   :  { %v28_v2 = vsel %vm27_vm0, %v480_v0, 0.0  ;;  %v29_v3 = vsel %vm27_vm0, %v485_v1, 0.0  ;;  %v499_v5 = vld [vmem:[%s528_s0 + $0x8] sm:$0xf0]  ;;  %v202_v7 = vsel %vm201_vm1, %v494_v4, 0.0 }
   0x3   :  { %v30_v6 = vadd.f32 %v29_v3, %v28_v2  ;;  %v203_v8 = vsel %vm201_vm1, %v499_v5, 0.0 }
   0x4   :  { %10 = vsyncpa [#allocation3], 0  ;;  %v204_v9 = vadd.f32 %v203_v8, %v202_v7  ;;  %v443_v10 = vmov 0.0   ;;  %vm444_vm2 = vmmov 0   ;;  %v21_v13 = vld [vmem:[%s529_s1] sm:$0xff]  ;;  %vm34_vm3 = vcmask 31744  }
   0x5   :  { %31 = vadd.xlane.f32.xlu0 %v30_v6  ;;  %395 = vmatprep.subr.mxu0 %v443_v10  ;;  %v22_v17 = vld [vmem:[%s530_s2] sm:$0xff]  ;;  %vm112_vm4 = vcmask 64512   ;;  %v445_v27 = vmov 0  }
   0x6   :  { %400 = vmatprep.subr.mxu1 %v443_v10  ;;  %397 = vmatprep.mubr.msk.f32.mxu0 %vm444_vm2, %v443_v10  ;;  %v23_v22 = vld [vmem:[%s531_s3] sm:$0xf]  ;;  %s446_s3 = smov [#allocation2]  }
   0x7   :  { %402 = vmatprep.mubr.msk.f32.mxu1 %vm444_vm2, %v443_v10  ;;  %419 = vset.pattern.permute.xlu1 %v445_v27  ;;  %v24_v28 = vld [vmem:[%s532_s4] sm:$0xf]  ;;  %s373_s4 = sshll.u32 %s446_s3, 4  ;;  %s374_s4 = int_to_ptr.vmem [resolvable:$true] %s373_s4 }
   0x8   :  { %420 = vset.pattern.permute.xlu0 %v445_v27  ;;  %s421_s6 = scalar_lea.vmem %s374_s4, 256  ;;  %p426_p1 = scmp.lt.s32.totalorder %s374_s4, %s374_s4 }
   0x9   :  { %205 = vadd.xlane.f32.xlu0 %v204_v9  ;;  %p422_p0 = scmp.ne.s32.totalorder %s374_s4, %s421_s6  ;;  %p427_p2 = scmp.lt.s32.totalorder %s421_s6, %s421_s6 }
   0xb   :  { %p428_p3 = por %p427_p2, %p426_p1 }
   0xd   :  { %p429_p4 = pnand %p428_p3, %p422_p0 }
  0x8e   :  { %v32_v11 = vpop.xlane.xlu0 %31 }
  0x8f   :  { %v33_v12 = vmul.f32 0.00390625, %v32_v11 }
  0x91   :  { %396 = vmatpush3.msk.msra.mxu0 %vm27_vm0, %v33_v12 }
  0x92   :  { %v206_v14 = vpop.xlane.xlu0 %205  ;;  %398 = vmatmul.mubr.msk.f32.vlgmr.msra.gmra.mxu0 %vm34_vm3, %v21_v13  ;;  %405 = vmatprep.subr.mxu0 %v443_v10 }
  0x93   :  { %v207_v15 = vmul.f32 0.00390625, %v206_v14  ;;  %407 = vmatprep.mubr.msk.f32.mxu0 %vm444_vm2, %v443_v10 }
  0x95   :  { %v209_v16 = vrot.slane %v207_v15, 4 }
  0x97   :  { %406 = vmatpush3.msk.msra.mxu0 %vm27_vm0, %v209_v16 }
  0x98   :  { %408 = vmatmul.mubr.msk.f32.vlgmr.msra.gmra.mxu0 %vm34_vm3, %v21_v13 }
 0x152   :  { %v107_v18 = vpop.f32.mrf.mxu0 }
 0x153   :  { %v108_v19 = vadd.f32 %v107_v18, %v22_v17 }
 0x154   :  { %v399_v20 = vpop.f32.mrf.mxu0 }
 0x155   :  { %v111_v21 = vmax.f32 %v108_v19, 0.0 }
 0x157   :  { %401 = vmatpush3.msra.mxu1 %v111_v21 }
 0x158   :  { %v278_v23 = vpop.f32.mrf.mxu0  ;;  %403 = vmatmul.mubr.msk.f32.vlgmr.msra.gmra.mxu1 %vm112_vm4, %v23_v22  ;;  %410 = vmatprep.subr.mxu1 %v443_v10 }
 0x159   :  { %v279_v24 = vadd.f32 %v278_v23, %v22_v17  ;;  %412 = vmatprep.mubr.msk.f32.mxu1 %vm444_vm2, %v443_v10 }
 0x15a   :  { %v409_v25 = vpop.f32.mrf.mxu0 }
 0x15b   :  { %v282_v26 = vmax.f32 %v279_v24, 0.0 }
 0x15d   :  { %411 = vmatpush3.msra.mxu1 %v282_v26 }
 0x15e   :  { %413 = vmatmul.mubr.msk.f32.vlgmr.msra.gmra.mxu1 %vm112_vm4, %v23_v22 }
 0x218   :  { %v182_v29 = vpop.f32.mrf.mxu1 }
 0x219   :  { %v183_v31 = vadd.f32 %v182_v29, %v24_v28 }
 0x21a   :  { %v404_v30 = vpop.f32.mrf.mxu1 }
 0x21b   :  { %v186_v33 = vadd.f32 3.0, %v183_v31 }
 0x21d   :  { %v187_v37 = vmax.f32 %v186_v33, 0.0 }
 0x21e   :  { %v349_v32 = vpop.f32.mrf.mxu1 }
 0x21f   :  { %v350_v34 = vadd.f32 %v349_v32, %v24_v28  ;;  %v188_v40 = vmin.f32 %v187_v37, 6.0 }
 0x220   :  { %v414_v35 = vpop.f32.mrf.mxu1 }
 0x221   :  { %v353_v36 = vadd.f32 3.0, %v350_v34  ;;  %v189_v42 = vmul.f32 0.16666667, %v188_v40 }
 0x223   :  { %v354_v38 = vmax.f32 %v353_v36, 0.0 }
 0x225   :  { %v355_v39 = vmin.f32 %v354_v38, 6.0 }
 0x227   :  { %v356_v41 = vmul.f32 0.16666667, %v355_v39 }
 0x229   :  { %359 = vperm.xlu1 %419, %v356_v41  }
 0x22d   :  { %192 = vperm.xlu1 %419, %v189_v42  }
 0x2a4   :  { %v360_v43 = vpop.permute.xlu1 %359 }
 0x2a5   :  { %v361_v44 = vrot.slane %v360_v43, 4 }
 0x2a7   :  { %v363_v45 = vmul.f32 %v361_v44, %v494_v4  ;;  %v364_v46 = vmul.f32 %v361_v44, %v499_v5 }
 0x2a8   :  { %v193_v47 = vpop.permute.xlu1 %192 }
 0x2a9   :  { %365 = vst [vmem:[#allocation2] sm:$0xf0] %v363_v45  ;;  %366 = vst [vmem:[#allocation2 + $0x8] sm:$0xf0] %v364_v46  ;;  %v195_v48 = vmul.f32 %v193_v47, %v480_v0  ;;  %v196_v49 = vmul.f32 %v193_v47, %v485_v1 }
 0x2ab   :  { %197 = vst [vmem:[#allocation2] sm:$0xf] %v195_v48  ;;  %198 = vst [vmem:[#allocation2 + $0x8] sm:$0xf] %v196_v49 }
 0x2ac   :  { %432 = shalt.err (!%p429_p4)
}
 0x2ad   :  { %376 = dma.vmem_to_hbm [thread:$0]  %s374_s4, 256, %s533_s5, [#allocation3]  }
 0x2ae   :  { %441 = dma.done.wait [#allocation3], 256  }
 0x2af   :  { %442 = vsyncadd [#allocation3], 4294967040 }
 0x2b0   :  { %380 = vsyncpa [#allocation3], 1 }

</bundles_post_ra>
